<compile_context>
chip_gen: v6e
topology: v6e:2x2x1
jax: 0.10.0
libtpu: 0.0.40
codegen_flags: <defaults>
</compile_context>

<pallas_src>
import jax
import jax.numpy as jnp
from jax.experimental import pallas as pl
from jax.experimental.pallas import tpu as pltpu

# ---------------- config (small, consistent with the module) ----------------
BATCH = 2
SEQ = 8
N_EMBD = 32
N_INNER = 4 * N_EMBD  # GPT-2 default intermediate_size


def gpt2_mlp_kernel(x_ref, w_fc_ref, b_fc_ref, w_pr_ref, b_pr_ref, o_ref):
    """c_fc (Conv1D) -> ReLU -> c_proj (Conv1D). Dropout is identity.

    x_ref:    (R, E)   activations, R = B*S rows
    w_fc_ref: (E, I)   Conv1D weight (input-major, i.e. x @ W + b)
    b_fc_ref: (1, I)
    w_pr_ref: (I, E)
    b_pr_ref: (1, E)
    o_ref:    (R, E)
    """
    x = x_ref[...]

    # c_fc: (R, E) @ (E, I) + (1, I)  -> lane-dense (R, 128) tile
    h = jnp.dot(x, w_fc_ref[...], preferred_element_type=jnp.float32) + b_fc_ref[...]

    # ReLU (VPU)
    h = jnp.maximum(h, 0.0)

    # c_proj: (R, I) @ (I, E) + (1, E)
    h = jnp.dot(h, w_pr_ref[...], preferred_element_type=jnp.float32) + b_pr_ref[...]

    # TODO(synk): nn.Dropout(resid_pdrop) has no in-kernel equivalent here; identity (eval).
    o_ref[...] = h.astype(o_ref.dtype)


def gpt2_mlp(x, params):
    """x: (B, S, E) -> (B, S, E). Single un-gridded pallas_call on (B*S, E)."""
    B, S, E = x.shape
    R = B * S
    I = params["w_fc"].shape[1]
    assert params["w_fc"].shape == (E, I)
    assert params["w_pr"].shape == (I, E)

    # Fold batch into rows (free XLA reshape outside the kernel).
    x2d = x.reshape(R, E)

    vmem_spec = pl.BlockSpec(memory_space=pltpu.MemorySpace.VMEM)

    out2d = pl.pallas_call(
        gpt2_mlp_kernel,
        out_shape=jax.ShapeDtypeStruct((R, E), x.dtype),
        in_specs=[vmem_spec] * 5,          # full-array blocks, resident in VMEM
        out_specs=vmem_spec,
    )(x2d, params["w_fc"], params["b_fc"], params["w_pr"], params["b_pr"])

    return out2d.reshape(B, S, E)


# ---------------- pure-JAX reference (mirrors the PyTorch forward) ----------------
def gpt2_mlp_ref(x, params):
    # Conv1D: x @ W + b  (weights stored (nx, nf), i.e. already "transposed linear")
    h = x @ params["w_fc"] + params["b_fc"][0]
    h = jnp.maximum(h, 0.0)           # ReLU
    h = h @ params["w_pr"] + params["b_pr"][0]
    return h                          # dropout identity


def init_params(key):
    ks = jax.random.split(key, 4)
    E, I = N_EMBD, N_INNER

    def w(k, shape):
        return (0.02 * jax.random.normal(k, shape)).astype(jnp.float32)

    # Conv1D init is N(0, 0.02) weights, zero bias; use small random biases here
    # purely to exercise the bias-add path in the correctness check.
    return {
        "w_fc": w(ks[0], (E, I)),
        "b_fc": (0.02 * jax.random.normal(ks[1], (1, I))).astype(jnp.float32),
        "w_pr": w(ks[2], (I, E)),
        "b_pr": (0.02 * jax.random.normal(ks[3], (1, E))).astype(jnp.float32),
    }


if __name__ == "__main__":
    key = jax.random.PRNGKey(0)
    k_x, k_p = jax.random.split(key)

    x = jax.random.normal(k_x, (BATCH, SEQ, N_EMBD), dtype=jnp.float32)
    params = init_params(k_p)

    out = gpt2_mlp(x, params)
    out = jax.block_until_ready(out)

    ref = gpt2_mlp_ref(x, params)
    assert out.shape == (BATCH, SEQ, N_EMBD)
    assert jnp.allclose(out, ref, atol=1e-4, rtol=1e-4), "mismatch vs reference"

    print("KERNEL_OK")
</pallas_src>

<mosaic_0001>
module attributes {stable_mosaic.version = 11 : i64} {
  func.func @gpt2_mlp_kernel(%arg0: memref<16x32xf32, #tpu.memory_space<vmem>>, %arg1: memref<32x128xf32, #tpu.memory_space<vmem>>, %arg2: memref<1x128xf32, #tpu.memory_space<vmem>>, %arg3: memref<128x32xf32, #tpu.memory_space<vmem>>, %arg4: memref<1x32xf32, #tpu.memory_space<vmem>>, %arg5: memref<16x32xf32, #tpu.memory_space<vmem>>) attributes {dimension_semantics = [], scalar_prefetch = 0 : i64, scratch_operands = 0 : i64, tpu.core_type = #tpu.core_type<tc>} {
    %c0 = arith.constant 0 : index
    %c0_0 = arith.constant 0 : index
    %0 = vector.load %arg0[%c0, %c0_0] : memref<16x32xf32, #tpu.memory_space<vmem>>, vector<16x32xf32>
    %c0_1 = arith.constant 0 : index
    %c0_2 = arith.constant 0 : index
    %1 = vector.load %arg1[%c0_1, %c0_2] : memref<32x128xf32, #tpu.memory_space<vmem>>, vector<32x128xf32>
    %cst = arith.constant dense<0.000000e+00> : vector<16x128xf32>
    %2 = tpu.matmul %0, %1, %cst {dimension_numbers = #tpu.dot_dimension_numbers<[1], [0], [0], [1], [0, 0, 1, 1], [], []>} : vector<16x32xf32>, vector<32x128xf32>, vector<16x128xf32> -> vector<16x128xf32>
    %c0_3 = arith.constant 0 : index
    %c0_4 = arith.constant 0 : index
    %3 = vector.load %arg2[%c0_3, %c0_4] : memref<1x128xf32, #tpu.memory_space<vmem>>, vector<1x128xf32>
    %4 = vector.broadcast %3 : vector<1x128xf32> to vector<16x128xf32>
    %5 = arith.addf %2, %4 : vector<16x128xf32>
    %cst_5 = arith.constant 0.000000e+00 : f32
    %6 = vector.broadcast %cst_5 : f32 to vector<16x128xf32>
    %7 = arith.maximumf %5, %6 : vector<16x128xf32>
    %c0_6 = arith.constant 0 : index
    %c0_7 = arith.constant 0 : index
    %8 = vector.load %arg3[%c0_6, %c0_7] : memref<128x32xf32, #tpu.memory_space<vmem>>, vector<128x32xf32>
    %cst_8 = arith.constant dense<0.000000e+00> : vector<16x32xf32>
    %9 = tpu.matmul %7, %8, %cst_8 {dimension_numbers = #tpu.dot_dimension_numbers<[1], [0], [0], [1], [0, 0, 1, 1], [], []>} : vector<16x128xf32>, vector<128x32xf32>, vector<16x32xf32> -> vector<16x32xf32>
    %c0_9 = arith.constant 0 : index
    %c0_10 = arith.constant 0 : index
    %10 = vector.load %arg4[%c0_9, %c0_10] : memref<1x32xf32, #tpu.memory_space<vmem>>, vector<1x32xf32>
    %11 = vector.broadcast %10 : vector<1x32xf32> to vector<16x32xf32>
    %12 = arith.addf %9, %11 : vector<16x32xf32>
    %c0_11 = arith.constant 0 : index
    %c0_12 = arith.constant 0 : index
    %13 = vector.load %arg5[%c0_11, %c0_12] : memref<16x32xf32, #tpu.memory_space<vmem>>, vector<16x32xf32>
    tpu.vector_store %arg5[%c0_11, %c0_12], %12 {strides = array<i32>} : memref<16x32xf32, #tpu.memory_space<vmem>>, vector<16x32xf32>,
    return
  }
}

</mosaic_0001>

<bundles_post_ra>
// kernel: tpu_custom_call.1
= control target key start
LH: loop header
LB: loop body
LE: loop exit
PB: predicated region body
PF: predicated region fallthrough
CT: control target
= control target key end

     0   :  { %vm34_vm0 = vcmask 261120   ;;  %s445_s0 = inlined_call_operand.vmem [shape: f32[16,32], index: 0, kind: input, shape index: {}]   ;;  %s446_s1 = inlined_call_operand.vmem [shape: f32[32,128], index: 1, kind: input, shape index: {}]   ;;  %s447_s2 = inlined_call_operand.vmem [shape: f32[1,128], index: 2, kind: input, shape index: {}]   ;;  %s448_s3 = inlined_call_operand.vmem [shape: f32[128,32], index: 3, kind: input, shape index: {}]   ;;  %s449_s4 = inlined_call_operand.vmem [shape: f32[1,32], index: 4, kind: input, shape index: {}]   ;;  %s450_s5 = inlined_call_operand.hbm [shape: f32[16,32], index: 5, kind: output, shape index: {}]  }
   0x1   :  { %v26_v0 = vld [vmem:[%s446_s1 + $0x18] sm:$0xff]  ;;  %v25_v1 = vld [vmem:[%s446_s1 + $0x10] sm:$0xff]  ;;  %v21_v2 = vld [vmem:[%s445_s0] sm:$0xff] }
   0x2   :  { %262 = vmatprep.subr.mxu0 %v26_v0  ;;  %v24_v3 = vld [vmem:[%s446_s1 + $0x8] sm:$0xff]  ;;  %270 = vmatprep.mubr.msk.f32.mxu0 %vm34_vm0, %v21_v2  ;;  %v133_v4 = vld [vmem:[%s448_s3 + $0x78] sm:$0xff]  ;;  %v132_v5 = vld [vmem:[%s448_s3 + $0x70] sm:$0xff] }
   0x3   :  { %263 = vmatpush3.msra.mxu0 %v26_v0  ;;  %273 = vmatprep.subr.mxu1 %v133_v4  ;;  %v23_v6 = vld [vmem:[%s446_s1] sm:$0xff]  ;;  %v131_v7 = vld [vmem:[%s448_s3 + $0x68] sm:$0xff] }
   0x4   :  { %264 = vmatprep.subr.mxu0 %v25_v1  ;;  %274 = vmatpush3.msra.mxu1 %v133_v4  ;;  %v22_v8 = vld [vmem:[%s445_s0 + $0x8] sm:$0xff]  ;;  %v130_v9 = vld [vmem:[%s448_s3 + $0x60] sm:$0xff] }
   0x5   :  { %265 = vmatpush3.msra.mxu0 %v25_v1  ;;  %275 = vmatprep.subr.mxu1 %v132_v5 }
   0x6   :  { %266 = vmatprep.subr.mxu0 %v24_v3  ;;  %276 = vmatpush3.msra.mxu1 %v132_v5 }
   0x7   :  { %267 = vmatpush3.msra.mxu0 %v24_v3 }
   0x8   :  { %10 = vsyncpa [#allocation3], 0  ;;  %268 = vmatprep.subr.mxu0 %v23_v6  ;;  %277 = vmatprep.subr.mxu1 %v131_v7  ;;  %v129_v10 = vld [vmem:[%s448_s3 + $0x58] sm:$0xff]  ;;  %v128_v11 = vld [vmem:[%s448_s3 + $0x50] sm:$0xff] }
   0x9   :  { %269 = vmatpush3.msra.mxu0 %v23_v6  ;;  %278 = vmatpush3.msra.mxu1 %v131_v7  ;;  %v127_v12 = vld [vmem:[%s448_s3 + $0x48] sm:$0xff]  ;;  %v126_v13 = vld [vmem:[%s448_s3 + $0x40] sm:$0xff]  ;;  %v125_v14 = vld [vmem:[%s448_s3 + $0x38] sm:$0xff] }
   0xa   :  { %271 = vmatmul.mubr.msk.f32.vlgmr.msra.gmra.mxu0 %vm34_vm0, %v22_v8  ;;  %279 = vmatprep.subr.mxu1 %v130_v9  ;;  %v124_v15 = vld [vmem:[%s448_s3 + $0x30] sm:$0xff]  ;;  %v123_v16 = vld [vmem:[%s448_s3 + $0x28] sm:$0xff]  ;;  %v122_v17 = vld [vmem:[%s448_s3 + $0x20] sm:$0xff] }
   0xb   :  { %280 = vmatpush3.msra.mxu1 %v130_v9  ;;  %v121_v18 = vld [vmem:[%s448_s3 + $0x18] sm:$0xff]  ;;  %v120_v19 = vld [vmem:[%s448_s3 + $0x10] sm:$0xff]  ;;  %v119_v20 = vld [vmem:[%s448_s3 + $0x8] sm:$0xff] }
   0xc   :  { %281 = vmatprep.subr.mxu1 %v129_v10  ;;  %v118_v21 = vld [vmem:[%s448_s3] sm:$0xff]  ;;  %s333_s3 = smov [#allocation2]  }
   0xd   :  { %282 = vmatpush3.msra.mxu1 %v129_v10  ;;  %v234_v22 = vld [vmem:[%s447_s2] ss:$0 sm:$0xff]  ;;  %s223_s13 = sshll.u32 %s333_s3, 4  ;;  %s224_s13 = int_to_ptr.vmem [resolvable:$true] %s223_s13 }
   0xe   :  { %283 = vmatprep.subr.mxu1 %v128_v11  ;;  %v237_v29 = vld [vmem:[%s449_s4] ss:$0 sm:$0xff]  ;;  %s311_s2 = scalar_lea.vmem %s224_s13, 256  ;;  %p316_p1 = scmp.lt.s32.totalorder %s224_s13, %s224_s13 }
   0xf   :  { %284 = vmatpush3.msra.mxu1 %v128_v11  ;;  %p312_p0 = scmp.ne.s32.totalorder %s224_s13, %s311_s2  ;;  %p317_p2 = scmp.lt.s32.totalorder %s311_s2, %s311_s2 }
  0x10   :  { %285 = vmatprep.subr.mxu1 %v127_v12 }
  0x11   :  { %286 = vmatpush3.msra.mxu1 %v127_v12  ;;  %p318_p3 = por %p317_p2, %p316_p1 }
  0x12   :  { %287 = vmatprep.subr.mxu1 %v126_v13 }
  0x13   :  { %288 = vmatpush3.msra.mxu1 %v126_v13  ;;  %p319_p4 = pnand %p318_p3, %p312_p0 }
  0x14   :  { %289 = vmatprep.subr.mxu1 %v125_v14 }
  0x15   :  { %290 = vmatpush3.msra.mxu1 %v125_v14 }
  0x16   :  { %291 = vmatprep.subr.mxu1 %v124_v15 }
  0x17   :  { %292 = vmatpush3.msra.mxu1 %v124_v15 }
  0x18   :  { %293 = vmatprep.subr.mxu1 %v123_v16 }
  0x19   :  { %294 = vmatpush3.msra.mxu1 %v123_v16 }
  0x1a   :  { %295 = vmatprep.subr.mxu1 %v122_v17 }
  0x1b   :  { %296 = vmatpush3.msra.mxu1 %v122_v17 }
  0x1c   :  { %297 = vmatprep.subr.mxu1 %v121_v18 }
  0x1d   :  { %298 = vmatpush3.msra.mxu1 %v121_v18 }
  0x1e   :  { %299 = vmatprep.subr.mxu1 %v120_v19 }
  0x1f   :  { %300 = vmatpush3.msra.mxu1 %v120_v19 }
  0x20   :  { %301 = vmatprep.subr.mxu1 %v119_v20 }
  0x21   :  { %302 = vmatpush3.msra.mxu1 %v119_v20 }
  0x22   :  { %303 = vmatprep.subr.mxu1 %v118_v21 }
  0x23   :  { %304 = vmatpush3.msra.mxu1 %v118_v21 }
  0xca   :  { %v272_v23 = vpop.f32.mrf.mxu0 }
  0xcb   :  { %v113_v24 = vadd.f32 %v272_v23, %v234_v22 }
  0xcc   :  { %v107_v25 = vpop.f32.mrf.mxu0 }
  0xcd   :  { %v108_v26 = vadd.f32 %v234_v22, %v107_v25  ;;  %v117_v28 = vmax.f32 %v113_v24, 0.0 }
  0xcf   :  { %v116_v27 = vmax.f32 %v108_v26, 0.0 }
  0xd1   :  { %305 = vmatprep.mubr.f32.mxu1 %v116_v27 }
  0xd2   :  { %306 = vmatmul.mubr.f32.vlgmr.msra.gmra.mxu1 %v117_v28 }
 0x192   :  { %v307_v30 = vpop.f32.mrf.mxu1 }
 0x193   :  { %v213_v31 = vadd.f32 %v307_v30, %v237_v29 }
 0x194   :  { %v207_v32 = vpop.f32.mrf.mxu1 }
 0x195   :  { %217 = vst.msk [vmem:[#allocation2 + $0x8] sm:$0xff] %vm34_vm0, %v213_v31  ;;  %v208_v33 = vadd.f32 %v237_v29, %v207_v32 }
 0x197   :  { %216 = vst.msk [vmem:[#allocation2] sm:$0xff] %vm34_vm0, %v208_v33 }
 0x198   :  { %322 = shalt.err (!%p319_p4)
}
 0x199   :  { %s334_s14 = smov 128   ;;  %s335_s4 = smov 8  }
 0x19a   :  { %229 = dma.vmem_to_hbm [thread:$0]  %s224_s13, 256, %s450_s5, [#allocation3], %s334_s14, %s334_s14, %s335_s4  }
 0x19b   :  { %331 = dma.done.wait [#allocation3], 256  }
 0x19c   :  { %332 = vsyncadd [#allocation3], 4294967040 }
 0x19d   :  { %233 = vsyncpa [#allocation3], 1 }

</bundles_post_ra>
